<compile_context>
chip_gen: v5e
topology: v5e:2x2
jax: 0.10.0
libtpu: 0.0.40
codegen_flags: <defaults>
</compile_context>

<pallas_src>
import math

import jax
import jax.numpy as jnp
from jax.experimental import pallas as pl
from jax.experimental.pallas import tpu as pltpu


def _mask_mul_kernel(mask_ref, x_ref, o_ref):
    # mask_ref: (tile_rows, 1) per-row keep mask (0.0 / 1.0)
    # x_ref / o_ref: (tile_rows, tile_cols) slab of samples
    o_ref[...] = x_ref[...] * mask_ref[...]


def _round_up(v: int, m: int) -> int:
    return -(-v // m) * m


def _sublane_pack(itemsize: int) -> int:
    # Rows per vreg: f32 -> 8, bf16 -> 16, int8/fp8 -> 32.
    return max(8, 32 // max(1, itemsize))


def _vmem_budget():
    """Returns (per-block byte budget for x, scoped-VMEM cap for the kernel)."""
    try:
        info = pltpu.get_tpu_info()
        vmem = int(getattr(info, "vmem_capacity_bytes", 0)) or (64 << 20)
    except Exception:  # pragma: no cover - conservative fallback
        vmem = 64 << 20  # v7x per-TC physical VMEM (smallest current gen)
    # ~1/8 of physical VMEM of x per grid step (x4 with in/out double
    # buffering): ~8 MiB blocks on every current generation.
    block = int(min(8 << 20, max(1 << 20, vmem // 8)))
    cap = int(vmem * 3 // 4)  # never request more than 3/4 of physical VMEM
    return block, cap


def _repack_factor(batch: int, feat: int, sublane: int) -> int:
    """Smallest R so that (B, F) -> (B*R, F/R) has sublane-dense rows and a
    lane-aligned (multiple-of-128) row width; 1 when no clean factor exists."""
    if batch % sublane == 0:
        return 1
    limit = min(feat, 4096)
    for r in range(1, limit + 1):
        if feat % r == 0 and (batch * r) % sublane == 0 and (feat // r) % 128 == 0:
            return r
    return 1


def apply_sample_mask(x, mask):
    """out[b] = x[b] * mask[b]; `mask` holds one scalar per sample (shape (B,) or (B,1))."""
    B = x.shape[0]
    F = int(math.prod(x.shape[1:])) if x.ndim > 1 else 1
    itemsize = jnp.dtype(x.dtype).itemsize
    sublane = _sublane_pack(itemsize)
    block_budget, vmem_cap = _vmem_budget()

    # Sublane-dense repack for small batches: (B, F) -> (B*R, F/R).
    R = _repack_factor(B, F, sublane)
    rows, cols = B * R, F // R
    xr = x.reshape(rows, cols)
    m = mask.reshape(B, 1).astype(x.dtype)
    if R > 1:
        m = jnp.repeat(m, R, axis=0)  # (rows, 1), one scalar per packed row

    eff = lambda r: _round_up(r, sublane)  # rows incl. sublane padding in VMEM
    row_bytes = cols * itemsize

    if eff(rows) * row_bytes <= block_budget:
        tile_rows, tile_cols = rows, cols            # everything fits one block
    elif sublane * row_bytes <= block_budget:
        tile_rows = (block_budget // row_bytes) // sublane * sublane
        tile_rows = max(sublane, min(tile_rows, rows))
        tile_cols = cols                             # full contiguous rows
    else:
        tile_rows, tile_cols = min(rows, sublane), 0  # 2-D fallback below

    if tile_cols == cols:
        # 1-D grid over the batch/row axis; each block is one contiguous HBM range.
        if (pl.cdiv(rows, tile_rows) < 2 and rows >= 2 * sublane
                and rows * row_bytes >= (2 << 20)):
            # Keep >= 2 grid steps so both v7x TensorCores get work.
            tile_rows = min(rows, _round_up(pl.cdiv(rows, 2), sublane))
        grid = (pl.cdiv(rows, tile_rows),)
        in_specs = [
            pl.BlockSpec((tile_rows, 1), lambda i: (i, 0)),       # per-row mask
            pl.BlockSpec((tile_rows, cols), lambda i: (i, 0)),    # contiguous x slab
        ]
        out_specs = pl.BlockSpec((tile_rows, cols), lambda i: (i, 0))
        dims = ("parallel",)
    else:
        # Rows too wide for the budget: 2-D grid (row tiles x lane-aligned col tiles).
        per_row_bytes = eff(tile_rows) * itemsize
        tile_cols = max(128, (block_budget // per_row_bytes) // 128 * 128)
        tile_cols = min(tile_cols, cols)
        grid = (pl.cdiv(rows, tile_rows), pl.cdiv(cols, tile_cols))
        in_specs = [
            pl.BlockSpec((tile_rows, 1), lambda i, j: (i, 0)),
            pl.BlockSpec((tile_rows, tile_cols), lambda i, j: (i, j)),
        ]
        out_specs = pl.BlockSpec((tile_rows, tile_cols), lambda i, j: (i, j))
        dims = ("parallel", "parallel")

    tile_bytes = eff(tile_rows) * tile_cols * itemsize
    vmem_limit = int(min(max(4 * tile_bytes + (4 << 20), 16 << 20), vmem_cap))

    out = pl.pallas_call(
        _mask_mul_kernel,
        out_shape=jax.ShapeDtypeStruct((rows, cols), x.dtype),
        grid=grid,
        in_specs=in_specs,
        out_specs=out_specs,
        compiler_params=pltpu.CompilerParams(
            dimension_semantics=dims,
            vmem_limit_bytes=vmem_limit,
        ),
    )(m, xr)
    return out.reshape(x.shape)


def drop_path_pallas(x, drop_prob: float = 0.0, training: bool = False,
                     scale_by_keep: bool = True, *, key=None):
    """Pallas implementation of the reference drop_path (per-sample stochastic depth)."""
    if drop_prob == 0.0 or not training:
        return x
    if key is None:
        raise ValueError(
            "drop_path_pallas requires an explicit PRNG `key` when training with "
            "drop_prob > 0 (otherwise every call would reuse the identical mask).")
    keep_prob = 1.0 - drop_prob
    B = x.shape[0]
    # Per-sample Bernoulli(keep_prob) mask, computed once outside the kernel.
    mask = jax.random.bernoulli(key, keep_prob, (B, 1)).astype(x.dtype)
    # Reference returns x * random_tensor (no 1/keep_prob scaling) -> scale_by_keep unused.
    return apply_sample_mask(x, mask)


class DropPath:
    """Mirror of the PyTorch DropPath module (no trainable parameters)."""

    def __init__(self, drop_prob: float = 0.0, scale_by_keep: bool = True):
        self.drop_prob = drop_prob
        self.scale_by_keep = scale_by_keep
        self.training = True

    def __call__(self, x, key=None):
        return drop_path_pallas(x, self.drop_prob, self.training,
                                self.scale_by_keep, key=key)


if __name__ == "__main__":
    key = jax.random.PRNGKey(0)
    xkey, mkey, mkey2 = jax.random.split(key, 3)

    B, C, H, W = 2, 4, 16, 16           # F = 1024 -> repacked to (8, 256) for f32
    x = jax.random.normal(xkey, (B, C, H, W), dtype=jnp.float32)

    # Training mode with drop_prob > 0.
    mod = DropPath(drop_prob=0.5)
    y = jax.block_until_ready(mod(x, key=mkey))

    # Exact reference: x * per-sample Bernoulli(keep_prob) mask, no rescale.
    exp_mask = jax.random.bernoulli(mkey, 0.5, (B, 1)).astype(x.dtype)
    expected = x * exp_mask.reshape(B, 1, 1, 1)
    assert bool(jnp.allclose(y, expected)), "mismatch vs reference mask-multiply"

    # Every sample must be exactly kept or exactly zeroed.
    for b in range(B):
        kept = bool(jnp.allclose(y[b], x[b]))
        dropped = bool(jnp.allclose(y[b], 0.0))
        assert kept or dropped, "sample is neither fully kept nor fully dropped"

    # Eval mode / drop_prob == 0 are identities.
    mod.training = False
    assert bool(jnp.allclose(jax.block_until_ready(mod(x)), x))
    assert bool(jnp.allclose(drop_path_pallas(x, 0.0, True), x))

    # F = 432 (not a multiple of 128, no clean repack factor) -> full-row blocks,
    # no masked lane tail because the block spans the full feature width.
    x2 = jax.random.normal(xkey, (2, 3, 16, 9), dtype=jnp.float32)
    y2 = jax.block_until_ready(drop_path_pallas(x2, 0.3, True, key=mkey2))
    exp_mask2 = jax.random.bernoulli(mkey2, 0.7, (2, 1)).astype(x2.dtype)
    assert bool(jnp.allclose(y2, x2 * exp_mask2.reshape(2, 1, 1, 1)))

    # Larger batch + bf16 exercises batch-axis tiling with no repacking.
    x3 = jax.random.normal(xkey, (16, 8, 8, 32), dtype=jnp.bfloat16)
    y3 = jax.block_until_ready(drop_path_pallas(x3, 0.25, True, key=mkey))
    exp_mask3 = jax.random.bernoulli(mkey, 0.75, (16, 1)).astype(x3.dtype)
    assert bool(jnp.allclose(y3, x3 * exp_mask3.reshape(16, 1, 1, 1)))

    print("KERNEL_OK")
</pallas_src>

<mosaic_0001>
module attributes {stable_mosaic.version = 11 : i64} {
  func.func @_mask_mul_kernel(%arg0: i32, %arg1: memref<8x1xf32, #tpu.memory_space<vmem>>, %arg2: memref<8x256xf32, #tpu.memory_space<vmem>>, %arg3: memref<8x256xf32, #tpu.memory_space<vmem>>) attributes {dimension_semantics = [#tpu.dimension_semantics<parallel>], iteration_bounds = array<i64: 1>, scalar_prefetch = 0 : i64, scratch_operands = 0 : i64, tpu.core_type = #tpu.core_type<tc>, window_params = [{transform_indices = @transform_0, window_bounds = array<i64: 8, 1>}, {transform_indices = @transform_1, window_bounds = array<i64: 8, 256>}, {transform_indices = @transform_2, window_bounds = array<i64: 8, 256>}]} {
    %c0 = arith.constant 0 : index
    %c0_0 = arith.constant 0 : index
    %0 = vector.load %arg2[%c0, %c0_0] : memref<8x256xf32, #tpu.memory_space<vmem>>, vector<8x256xf32>
    %c0_1 = arith.constant 0 : index
    %c0_2 = arith.constant 0 : index
    %1 = vector.load %arg1[%c0_1, %c0_2] : memref<8x1xf32, #tpu.memory_space<vmem>>, vector<8x1xf32>
    %2 = vector.broadcast %1 : vector<8x1xf32> to vector<8x256xf32>
    %3 = arith.mulf %0, %2 : vector<8x256xf32>
    %c0_3 = arith.constant 0 : index
    %c0_4 = arith.constant 0 : index
    %4 = vector.load %arg3[%c0_3, %c0_4] : memref<8x256xf32, #tpu.memory_space<vmem>>, vector<8x256xf32>
    tpu.vector_store %arg3[%c0_3, %c0_4], %3 {strides = array<i32>} : memref<8x256xf32, #tpu.memory_space<vmem>>, vector<8x256xf32>,
    return
  }
  func.func @transform_0(%arg0: i32) -> (i32, i32) {
    %c0_i32 = arith.constant 0 : i32
    %c0_i32_0 = arith.constant 0 : i32
    return %arg0, %c0_i32 : i32, i32
  }
  func.func @transform_1(%arg0: i32) -> (i32, i32) {
    %c0_i32 = arith.constant 0 : i32
    %c0_i32_0 = arith.constant 0 : i32
    return %arg0, %c0_i32 : i32, i32
  }
  func.func @transform_2(%arg0: i32) -> (i32, i32) {
    %c0_i32 = arith.constant 0 : i32
    %c0_i32_0 = arith.constant 0 : i32
    return %arg0, %c0_i32 : i32, i32
  }
}

</mosaic_0001>

<bundles_post_ra>
// kernel: tpu_custom_call.1
= control target key start
LH: loop header
LB: loop body
LE: loop exit
PB: predicated region body
PF: predicated region fallthrough
CT: control target
= control target key end

     0   :  { %7 = vsyncpa [#allocation3], 0  ;;  %s138_s0 = inlined_call_operand.vmem [shape: f32[8,1], index: 0, kind: input, shape index: {}]   ;;  %s139_s1 = inlined_call_operand.hbm [shape: f32[8,256], index: 1, kind: input, shape index: {}]   ;;  %s140_s2 = inlined_call_operand.hbm [shape: f32[8,256], index: 2, kind: output, shape index: {}]  }
   0x1   :  { %8 = vsyncpa [#allocation4], 0  ;;  %s16_s11 = sshll.u32 %s139_s1, 4  ;;  %s111_s12 = smov [#allocation2]   ;;  %s17_s11 = int_to_ptr.hbm [resolvable:$true] %s16_s11 }
   0x2   :  { %s18_s13 = sshll.u32 %s111_s12, 4  ;;  %s19_s13 = int_to_ptr.vmem [resolvable:$true] %s18_s13 }
   0x3   :  { %21 = dma.hbm_to_vmem [thread:$0]  %s17_s11, 256, %s19_s13, [#allocation3]  }
   0x4   :  { %107 = dma.done.wait [#allocation3], 256  }
   0x5   :  { %108 = vsyncadd [#allocation3], 4294967040  ;;  %v112_v0 = vmov 0   ;;  %v28_v1 = vld [vmem:[%s138_s0] sm:$0xff]  ;;  %v27_v3 = vld [vmem:[#allocation2 + $0x8] sm:$0xff]  ;;  %s113_s16 = smov [#allocation5]  }
   0x6   :  { %58 = vset.pattern.permute.xlu0 %v112_v0  ;;  %v26_v2 = vld [vmem:[#allocation2] sm:$0xff]  ;;  %s43_s17 = sshll.u32 %s113_s16, 4  ;;  %s45_s19 = sshll.u32 %s140_s2, 4  ;;  %s44_s17 = int_to_ptr.vmem [resolvable:$true] %s43_s17  ;;  %s46_s19 = int_to_ptr.hbm [resolvable:$true] %s45_s19 }
   0x7   :  { %31 = vperm.xlu0 %58, %v28_v1  }
  0x79   :  { %v32_v4 = vpop.permute.xlu0 %31 }
  0x7a   :  { %v34_v5 = vmul.f32 %v32_v4, %v26_v2  ;;  %v35_v6 = vmul.f32 %v32_v4, %v27_v3 }
  0x7c   :  { %36 = vst [vmem:[#allocation5] sm:$0xff] %v34_v5 }
  0x7d   :  { %37 = vst [vmem:[#allocation5 + $0x8] sm:$0xff] %v35_v6 }
  0x7e   :  { %48 = dma.vmem_to_hbm [thread:$0]  %s44_s17, 256, %s46_s19, [#allocation4]  }
  0x7f   :  { %109 = dma.done.wait [#allocation4], 256  }
  0x80   :  { %110 = vsyncadd [#allocation4], 4294967040 }
  0x81   :  { %53 = vsyncpa [#allocation3], 1 }
  0x82   :  { %54 = vsyncpa [#allocation4], 1 }

</bundles_post_ra>
